<compile_context>
chip_gen: v6e
topology: v6e:2x2x1
jax: 0.10.0
libtpu: 0.0.40
codegen_flags: <defaults>
</compile_context>

<pallas_src>
import functools

import jax
import jax.numpy as jnp
from jax.experimental import pallas as pl
from jax.experimental.pallas import tpu as pltpu


def _round_up(x, m):
    return ((x + m - 1) // m) * m


# ----------------------------------------------------------------------------
# Pallas kernel: one fused, lane-dense linear over all heads
#   out[i*TM:(i+1)*TM, :] = cast_bf16(x_tile) @ W_fused + b_fused
# x tile  : [TM, H]     f32  (streamed, double-buffered; cast to bf16 in-kernel)
# W_fused : [H, C_pad]  bf16 (resident: constant index_map -> DMA'd only once)
# b_fused : [1, C_pad]  f32  (resident)
# out     : [TM, C_pad] f32  (lane-dense, C_pad == 128)
# ----------------------------------------------------------------------------
def _fused_heads_kernel(x_ref, w_ref, b_ref, out_ref):
    x = x_ref[...].astype(w_ref.dtype)          # in-kernel cast, hidden under DMA
    out_ref[...] = (
        jnp.dot(x, w_ref[...], preferred_element_type=jnp.float32)
        + b_ref[...]
    )


def _pick_tile_and_vmem(M, H, C_pad, tm):
    """Pick row tile TM and a VMEM limit that fit the chip generation."""
    try:
        vmem_cap = int(pltpu.get_tpu_info().vmem_capacity_bytes)
    except Exception:
        vmem_cap = 64 << 20                     # conservative (v7x per-TC VMEM)
    budget = max(16 << 20, (vmem_cap * 3) // 8)  # ~24 MiB v7x, ~48 MiB v5e/v6e
    resident = H * C_pad * 2 + C_pad * 4         # bf16 fused weight + f32 bias

    def need(t):                                 # double-buffered x (f32) + out (f32)
        return resident + 2 * t * H * 4 + 2 * t * C_pad * 4

    TM = max(8, min(tm, _round_up(M, 8)))
    TM = _round_up(TM, 8)
    while TM > 8 and need(TM) > budget:
        TM = max(8, _round_up(TM // 2, 8))
    vmem_limit = int(max(min(budget, need(TM) + (4 << 20)), 4 << 20))
    return TM, vmem_limit


@functools.partial(jax.jit, static_argnames=("tm",))
def fused_token_heads(encoded, w_fused, b_fused, *, tm=2048):
    """All heads as one lane-dense matmul over token rows.

    encoded : [B, S, H] float32 (or bf16) hidden states
    w_fused : [H, C_pad] bf16   fused weight [hidden2tag | hidden2t | 7 fc_*], zero padded
    b_fused : [1, C_pad] float32 fused bias
    Returns the padded [M_pad, C_pad] float32 logits block (callers slice lazily).
    """
    B, S, H = encoded.shape
    C_pad = w_fused.shape[1]
    M = B * S
    x = encoded.reshape(M, H)                   # free reshape; no copy / cast here

    TM, vmem_limit = _pick_tile_and_vmem(M, H, C_pad, tm)
    M_pad = _round_up(M, TM)
    if M_pad != M:
        # Rare: choose S / tm so TM divides B*S and this pad never fires.
        x = jnp.pad(x, ((0, M_pad - M), (0, 0)))

    grid = (M_pad // TM,)
    # TODO(synk): on v7x, try pltpu.CORE_PARALLEL (or an explicit 2-TC
    # pl.core_map) on the row axis so both TensorCores stream disjoint tiles.
    # TODO(synk): if the production lm_hidden_size is not a multiple of 128,
    # pad/pack H once upstream (or let XLA handle tiny H) - with H < 128 most
    # of each vreg lane and the MXU contraction depth is wasted.
    return pl.pallas_call(
        _fused_heads_kernel,
        out_shape=jax.ShapeDtypeStruct((M_pad, C_pad), jnp.float32),
        grid=grid,
        in_specs=[
            pl.BlockSpec((TM, H), lambda i: (i, 0)),      # streamed token rows
            pl.BlockSpec((H, C_pad), lambda i: (0, 0)),   # resident fused weight
            pl.BlockSpec((1, C_pad), lambda i: (0, 0)),   # resident fused bias
        ],
        out_specs=pl.BlockSpec((TM, C_pad), lambda i: (i, 0)),
        compiler_params=pltpu.CompilerParams(
            dimension_semantics=("parallel",),
            vmem_limit_bytes=vmem_limit),
    )(x, w_fused, b_fused)


# ----------------------------------------------------------------------------
# Parameters (nn.Linear-style init) + fused weights precomputed once
# ----------------------------------------------------------------------------
def make_params(key, vocab, H, tagger_classes, max_token, num_classes):
    ks = jax.random.split(key, 4)
    bound = 1.0 / jnp.sqrt(jnp.float32(H))

    def lin(k, out_dim):
        kw, kb = jax.random.split(k)
        w = jax.random.uniform(kw, (H, out_dim), jnp.float32, -bound, bound)
        b = jax.random.uniform(kb, (1, out_dim), jnp.float32, -bound, bound)
        return w, b

    w_tag, b_tag = lin(ks[0], tagger_classes)          # _hidden2tag
    w_t, b_t = lin(ks[1], max_token)                   # _hidden2t
    head_keys = jax.random.split(ks[2], 7)             # _fc_iwo .. _fc_um
    pool_heads = [lin(head_keys[i], num_classes) for i in range(7)]

    # Fuse once at parameter-load time (review item): concat + pad to 128 lanes
    # + bf16 cast, instead of rebuilding inside every jitted forward.
    C_seq = tagger_classes + max_token
    C = C_seq + 7 * num_classes
    C_pad = _round_up(max(C, 128), 128)
    w_all = jnp.concatenate([w_tag, w_t] + [w for w, _ in pool_heads], axis=1)
    b_all = jnp.concatenate([b_tag, b_t] + [b for _, b in pool_heads], axis=1)
    w_fused = jnp.pad(w_all, ((0, 0), (0, C_pad - C))).astype(jnp.bfloat16)
    b_fused = jnp.pad(b_all, ((0, 0), (0, C_pad - C))).astype(jnp.float32)

    # surrogate-encoder embedding table
    emb = jax.random.normal(ks[3], (vocab, H), jnp.float32) * 0.02
    return dict(w_all=w_all, b_all=b_all, w_fused=w_fused, b_fused=b_fused,
                emb=emb)


# ----------------------------------------------------------------------------
# Model wrapper mirroring TaggerModelTTI.forward
# ----------------------------------------------------------------------------
@functools.partial(
    jax.jit, static_argnames=("tagger_classes", "max_token", "num_classes"))
def tagger_model_tti_forward(params, input_ids, attention_mask, *,
                             tagger_classes, max_token, num_classes):
    # TODO(synk): the pretrained PLM transformer encoder has no clean Pallas
    # equivalent; a deterministic embedding-lookup surrogate produces `encoded`
    # (and pooler == CLS hidden state) with the same shapes/dtypes instead.
    encoded = jnp.take(params["emb"], input_ids, axis=0)             # [B, S, H]
    encoded = encoded * attention_mask[..., None].astype(encoded.dtype)

    # nn.Dropout is identity in eval/inference mode.
    out = fused_token_heads(encoded, params["w_fused"], params["b_fused"])

    B, S, _ = encoded.shape
    C_seq = tagger_classes + max_token
    seq = out[:B * S].reshape(B, S, -1)        # padded block; slice lazily here
    tagger_logits = seq[..., :tagger_classes]                        # [B,S,Ctag]
    t_logits = seq[..., tagger_classes:C_seq]                        # [B,S,max_token]
    # Pooler == encoded[:, 0, :] in this surrogate (dropout identity), so the
    # pooler-head logits are the fused columns C_seq: of each sequence's row 0.
    # TODO(synk): if the real PLM pooler is dense+tanh(CLS), apply that tiny
    # projection and run the 7 heads as a separate [B,H]@[H,7*num_classes]
    # matmul instead of reading row 0 here.
    pool = seq[:, 0, C_seq:C_seq + 7 * num_classes]                  # [B, 7*nc]
    type_logits = tuple(
        pool[:, i * num_classes:(i + 1) * num_classes] for i in range(7))
    return tagger_logits, t_logits, type_logits


# ----------------------------------------------------------------------------
if __name__ == "__main__":
    # small shapes consistent with the module
    B, S = 2, 8              # batch, sequence length
    H = 32                   # args.lm_hidden_size
    TAGGER_CLASSES = 5       # args.tagger_classes
    MAX_GENERATE = 5         # args.max_generate -> max_token = 6
    MAX_TOKEN = MAX_GENERATE + 1
    NUM_CLASSES = 4          # args.num_classes
    VOCAB = 100

    root = jax.random.PRNGKey(0)
    k_param, k_ids = jax.random.split(root)
    params = make_params(k_param, VOCAB, H, TAGGER_CLASSES, MAX_TOKEN,
                         NUM_CLASSES)

    input_ids = jax.random.randint(k_ids, (B, S), 0, VOCAB, dtype=jnp.int32)
    attention_mask = jnp.ones((B, S), dtype=jnp.int32)

    tagger_logits, t_logits, type_logits = tagger_model_tti_forward(
        params, input_ids, attention_mask,
        tagger_classes=TAGGER_CLASSES, max_token=MAX_TOKEN,
        num_classes=NUM_CLASSES)
    jax.block_until_ready((tagger_logits, t_logits, type_logits))

    # sanity: compare against a plain-JAX f32 reference of the same math
    # (kernel uses bf16 operands with f32 MXU accumulation -> relaxed tolerance)
    encoded = jnp.take(params["emb"], input_ids, axis=0)
    encoded = encoded * attention_mask[..., None].astype(encoded.dtype)
    pooler = encoded[:, 0, :]
    C_SEQ = TAGGER_CLASSES + MAX_TOKEN
    ref_seq = (encoded.reshape(B * S, H) @ params["w_all"][:, :C_SEQ]
               + params["b_all"][:, :C_SEQ]).reshape(B, S, -1)
    ref_pool = pooler @ params["w_all"][:, C_SEQ:] + params["b_all"][:, C_SEQ:]
    ATOL, RTOL = 2e-2, 2e-2
    assert jnp.allclose(tagger_logits, ref_seq[..., :TAGGER_CLASSES],
                        atol=ATOL, rtol=RTOL)
    assert jnp.allclose(t_logits, ref_seq[..., TAGGER_CLASSES:],
                        atol=ATOL, rtol=RTOL)
    for i in range(7):
        assert jnp.allclose(
            type_logits[i],
            ref_pool[:, i * NUM_CLASSES:(i + 1) * NUM_CLASSES],
            atol=ATOL, rtol=RTOL)

    print("KERNEL_OK")
</pallas_src>

<mosaic_0001>
module attributes {stable_mosaic.version = 11 : i64} {
  func.func @_fused_heads_kernel(%arg0: i32, %arg1: memref<16x32xf32, #tpu.memory_space<vmem>>, %arg2: memref<32x128xbf16, #tpu.memory_space<vmem>>, %arg3: memref<1x128xf32, #tpu.memory_space<vmem>>, %arg4: memref<16x128xf32, #tpu.memory_space<vmem>>) attributes {dimension_semantics = [#tpu.dimension_semantics<parallel>], iteration_bounds = array<i64: 1>, scalar_prefetch = 0 : i64, scratch_operands = 0 : i64, tpu.core_type = #tpu.core_type<tc>, window_params = [{transform_indices = @transform_0, window_bounds = array<i64: 16, 32>}, {pipeline_mode = #tpu.pipeline_mode<synchronous>, transform_indices = @transform_1, window_bounds = array<i64: 32, 128>}, {pipeline_mode = #tpu.pipeline_mode<synchronous>, transform_indices = @transform_2, window_bounds = array<i64: 1, 128>}, {transform_indices = @transform_3, window_bounds = array<i64: 16, 128>}]} {
    %c0 = arith.constant 0 : index
    %c0_0 = arith.constant 0 : index
    %0 = vector.load %arg1[%c0, %c0_0] : memref<16x32xf32, #tpu.memory_space<vmem>>, vector<16x32xf32>
    %1 = arith.truncf %0 : vector<16x32xf32> to vector<16x32xbf16>
    %c0_1 = arith.constant 0 : index
    %c0_2 = arith.constant 0 : index
    %2 = vector.load %arg2[%c0_1, %c0_2] : memref<32x128xbf16, #tpu.memory_space<vmem>>, vector<32x128xbf16>
    %cst = arith.constant dense<0.000000e+00> : vector<16x128xf32>
    %3 = tpu.matmul %1, %2, %cst {dimension_numbers = #tpu.dot_dimension_numbers<[1], [0], [0], [1], [0, 0, 1, 1], [], []>} : vector<16x32xbf16>, vector<32x128xbf16>, vector<16x128xf32> -> vector<16x128xf32>
    %c0_3 = arith.constant 0 : index
    %c0_4 = arith.constant 0 : index
    %4 = vector.load %arg3[%c0_3, %c0_4] : memref<1x128xf32, #tpu.memory_space<vmem>>, vector<1x128xf32>
    %5 = vector.broadcast %4 : vector<1x128xf32> to vector<16x128xf32>
    %6 = arith.addf %3, %5 : vector<16x128xf32>
    %c0_5 = arith.constant 0 : index
    %c0_6 = arith.constant 0 : index
    %7 = vector.load %arg4[%c0_5, %c0_6] : memref<16x128xf32, #tpu.memory_space<vmem>>, vector<16x128xf32>
    tpu.vector_store %arg4[%c0_5, %c0_6], %6 {strides = array<i32>} : memref<16x128xf32, #tpu.memory_space<vmem>>, vector<16x128xf32>,
    return
  }
  func.func @transform_0(%arg0: i32) -> (i32, i32) {
    %c0_i32 = arith.constant 0 : i32
    %c0_i32_0 = arith.constant 0 : i32
    return %arg0, %c0_i32 : i32, i32
  }
  func.func @transform_1(%arg0: i32) -> (i32, i32) {
    %c0_i32 = arith.constant 0 : i32
    %c0_i32_0 = arith.constant 0 : i32
    %c0_i32_1 = arith.constant 0 : i32
    return %c0_i32, %c0_i32_0 : i32, i32
  }
  func.func @transform_2(%arg0: i32) -> (i32, i32) {
    %c0_i32 = arith.constant 0 : i32
    %c0_i32_0 = arith.constant 0 : i32
    %c0_i32_1 = arith.constant 0 : i32
    return %c0_i32, %c0_i32_0 : i32, i32
  }
  func.func @transform_3(%arg0: i32) -> (i32, i32) {
    %c0_i32 = arith.constant 0 : i32
    %c0_i32_0 = arith.constant 0 : i32
    return %arg0, %c0_i32 : i32, i32
  }
}

</mosaic_0001>

<bundles_post_ra>
// kernel: fused_token_heads.1
= control target key start
LH: loop header
LB: loop body
LE: loop exit
PB: predicated region body
PF: predicated region fallthrough
CT: control target
= control target key end

     0   :  { %8 = vsyncpa [#allocation3], 0  ;;  %s274_s0 = inlined_call_operand.hbm [shape: f32[16,32], index: 0, kind: input, shape index: {}]   ;;  %s275_s1 = inlined_call_operand.hbm [shape: bf16[32,128], index: 1, kind: input, shape index: {}]   ;;  %s276_s2 = inlined_call_operand.vmem [shape: f32[1,128], index: 2, kind: input, shape index: {}]   ;;  %s277_s3 = inlined_call_operand.hbm [shape: f32[16,128], index: 3, kind: output, shape index: {}]  }
   0x1   :  { %9 = vsyncpa [#allocation6], 0 }
   0x2   :  { %10 = vsyncpa [#allocation4], 0  ;;  %s227_s12 = smov [#allocation2]  }
   0x3   :  { %s16_s13 = sshll.u32 %s227_s12, 4  ;;  %s17_s13 = int_to_ptr.vmem [resolvable:$true] %s16_s13 }
   0x4   :  { %s169_s14 = scalar_lea.vmem %s17_s13, 256  ;;  %p174_p1 = scmp.lt.s32.totalorder %s17_s13, %s17_s13 }
   0x5   :  { %p170_p0 = scmp.ne.s32.totalorder %s17_s13, %s169_s14  ;;  %p175_p2 = scmp.lt.s32.totalorder %s169_s14, %s169_s14 }
   0x7   :  { %p176_p3 = por %p175_p2, %p174_p1 }
   0x9   :  { %p177_p4 = pnand %p176_p3, %p170_p0 }
   0xb   :  { %180 = shalt.err (!%p177_p4)
}
   0xc   :  { %s228_s15 = smov 128   ;;  %s229_s16 = smov 8  }
   0xd   :  { %22 = dma.hbm_to_vmem [thread:$0]  %s274_s0, 256, %s17_s13, [#allocation3], %s228_s15, %s228_s15, %s229_s16  }
   0xe   :  { %s230_s19 = smov [#allocation5]  }
   0xf   :  { %s28_s20 = sshll.u32 %s230_s19, 4  ;;  %s29_s20 = int_to_ptr.vmem [resolvable:$true] %s28_s20 }
  0x10   :  { %s189_s21 = scalar_lea.vmem %s29_s20, 256  ;;  %p194_p6 = scmp.lt.s32.totalorder %s29_s20, %s29_s20 }
  0x11   :  { %p190_p5 = scmp.ne.s32.totalorder %s29_s20, %s189_s21  ;;  %p195_p7 = scmp.lt.s32.totalorder %s189_s21, %s189_s21 }
  0x13   :  { %p196_p8 = por %p195_p7, %p194_p6 }
  0x15   :  { %p197_p9 = pnand %p196_p8, %p190_p5 }
  0x17   :  { %200 = shalt.err (!%p197_p9)
}
  0x18   :  { %s231_s22 = smov 64   ;;  %s232_s23 = smov 4  }
  0x19   :  { %34 = dma.hbm_to_vmem [thread:$0]  %s275_s1, 256, %s29_s20, [#allocation6], %s231_s22, %s231_s22, %s232_s23  }
  0x1a   :  { %221 = dma.done.wait [#allocation3], 256  }
  0x1b   :  { %222 = vsyncadd [#allocation3], 4294967040 }
  0x1c   :  { %223 = dma.done.wait [#allocation6], 256  }
  0x1d   :  { %224 = vsyncadd [#allocation6], 4294967040  ;;  %v233_v0 = vmov 0.0   ;;  %vm234_vm0 = vmmov 0   ;;  %v159_v1 = vld [vmem:[#allocation5 + $0x8] sm:$0xff]   ;;  %v160_v2 = vld [vmem:[#allocation5] sm:$0xff]  }
  0x1e   :  { %142 = vmatprep.subr.bf16.mxu0 %v233_v0  ;;  %146 = vmatprep.mubr.msk.bf16.mxu0 %vm234_vm0, %v233_v0  ;;  %v44_v3 = vld [vmem:[#allocation2] sm:$0xff]  ;;  %v45_v4 = vld [vmem:[#allocation2 + $0x8] sm:$0xff]  ;;  %vm70_vm1 = vcmask 261120   ;;  %s235_s26 = smov [#allocation7]  }
  0x1f   :  { %143 = vmatpush3.bf16.msra.mxu0 %v159_v1  ;;  %v46_v5 = vpack.c.bf16 %v45_v4, %v44_v3  ;;  %v135_v6 = vld [vmem:[%s276_s2] ss:$0 sm:$0xff]  ;;  %s122_s27 = sshll.u32 %s235_s26, 4  ;;  %s123_s27 = int_to_ptr.vmem [resolvable:$true] %s122_s27 }
  0x20   :  { %144 = vmatprep.subr.bf16.mxu0 %v233_v0  ;;  %s201_s28 = scalar_lea.vmem %s123_s27, 256  ;;  %p206_p11 = scmp.lt.s32.totalorder %s123_s27, %s123_s27 }
  0x21   :  { %p202_p10 = scmp.ne.s32.totalorder %s123_s27, %s201_s28  ;;  %p207_p12 = scmp.lt.s32.totalorder %s201_s28, %s201_s28 }
  0x23   :  { %145 = vmatpush3.bf16.msra.mxu0 %v160_v2  ;;  %p208_p13 = por %p207_p12, %p206_p11 }
  0x25   :  { %p209_p0 = pnand %p208_p13, %p202_p10 }
  0x26   :  { %147 = vmatmul.mubr.msk.bf16.vlgmr.msra.gmra.mxu0 %vm70_vm1, %v46_v5 }
  0xe6   :  { %v108_v7 = vpop.f32.mrf.mxu0 }
  0xe7   :  { %v109_v8 = vadd.f32 %v135_v6, %v108_v7 }
  0xe8   :  { %v148_v9 = vpop.f32.mrf.mxu0 }
  0xe9   :  { %115 = vst [vmem:[#allocation7] sm:$0xff] %v109_v8 }
  0xea   :  { %v111_v10 = vpop.f32.mrf.mxu0 }
  0xeb   :  { %v112_v11 = vadd.f32 %v135_v6, %v111_v10 }
  0xec   :  { %v149_v12 = vpop.f32.mrf.mxu0 }
  0xed   :  { %116 = vst [vmem:[#allocation7 + $0x8] sm:$0xff] %v112_v11 }
  0xee   :  { %212 = shalt.err (!%p209_p0)
}
  0xef   :  { %128 = dma.vmem_to_hbm [thread:$0]  %s123_s27, 256, %s277_s3, [#allocation4], %s228_s15, %s228_s15, %s229_s16  }
  0xf0   :  { %225 = dma.done.wait [#allocation4], 256  }
  0xf1   :  { %226 = vsyncadd [#allocation4], 4294967040 }
  0xf2   :  { %132 = vsyncpa [#allocation3], 1 }
  0xf3   :  { %133 = vsyncpa [#allocation6], 1 }
  0xf4   :  { %134 = vsyncpa [#allocation4], 1 }

</bundles_post_ra>
